<compile_context>
chip_gen: v5e
topology: v5e:2x2
jax: 0.10.0
libtpu: 0.0.40
codegen_flags: <defaults>
</compile_context>

<pallas_src>
import jax
import jax.numpy as jnp
from jax.experimental import pallas as pl
from jax.experimental.pallas import tpu as pltpu

_NEG_LARGE = -1e30  # finite "-inf" for padded vocab columns (keeps exp() == 0)
_VMEM_LIMIT = 48 * 1024 * 1024  # safe on v7x (64 MiB); v6e has more headroom


def _round_up(a, b):
    return (a + b - 1) // b * b


# ----------------------------------------------------------------------------
# Pass 1: per-row logsumexp via online max / sum-exp over vocab tiles.
# ----------------------------------------------------------------------------
def _lse_kernel(x_ref, w_ref, b_ref, lse_ref, m_sc, l_sc):
    # x_ref  : (tm, d_model) bf16 input rows (resident across the vocab axis)
    # w_ref  : (d_model, tn) bf16 weight tile (pre-transposed, pre-padded)
    # b_ref  : (1, tn)       f32 bias tile (padded columns = -1e30)
    # lse_ref: (tm, 1)       f32 per-row logsumexp (resident across vocab axis)
    # m_sc,l_sc : (tm, 1)    f32 running max / running sum-exp scratch
    j = pl.program_id(1)

    @pl.when(j == 0)
    def _():
        m_sc[...] = jnp.full_like(m_sc, -jnp.inf)
        l_sc[...] = jnp.zeros_like(l_sc)

    # bf16 x bf16 -> f32 accumulation on the MXU.
    logits = jnp.dot(x_ref[...], w_ref[...],
                     preferred_element_type=jnp.float32) + b_ref[...]

    m_old = m_sc[...]
    m_new = jnp.maximum(m_old, jnp.max(logits, axis=-1, keepdims=True))
    l_sc[...] = (l_sc[...] * jnp.exp(m_old - m_new)
                 + jnp.sum(jnp.exp(logits - m_new), axis=-1, keepdims=True))
    m_sc[...] = m_new

    @pl.when(j == pl.num_programs(1) - 1)
    def _():
        lse_ref[...] = m_sc[...] + jnp.log(l_sc[...])


# ----------------------------------------------------------------------------
# Pass 2: recompute logits tile and write normalized log-probs directly.
# ----------------------------------------------------------------------------
def _out_kernel(x_ref, w_ref, b_ref, lse_ref, o_ref):
    logits = jnp.dot(x_ref[...], w_ref[...],
                     preferred_element_type=jnp.float32) + b_ref[...]
    o_ref[...] = (logits - lse_ref[...]).astype(o_ref.dtype)


# ----------------------------------------------------------------------------
# One-time parameter preparation (do NOT call per forward).
# ----------------------------------------------------------------------------
def prepare_generator_params(weight, bias, *, tn=1024):
    """Convert nn.Linear params for the Pallas forward.

    weight : (size, d_model)  -- PyTorch nn.Linear layout
    bias   : (size,)
    Returns a dict with the pre-transposed, bf16-cast, vocab-padded weight,
    the padded f32 bias row, and the tile size used for the vocab axis.
    """
    size, d_model = weight.shape
    tn_eff = min(tn, _round_up(size, 128))   # lane-dense vocab tiles
    n_pad = _round_up(size, tn_eff)

    w_t = jnp.asarray(weight, jnp.bfloat16).T            # (d_model, size)
    if n_pad != size:
        w_t = jnp.pad(w_t, ((0, 0), (0, n_pad - size)))
    b_row = jnp.asarray(bias, jnp.float32).reshape(1, size)
    if n_pad != size:
        b_row = jnp.pad(b_row, ((0, 0), (0, n_pad - size)),
                        constant_values=_NEG_LARGE)
    return {"w_t": w_t, "b": b_row, "size": size,
            "d_model": d_model, "tn": tn_eff}


# ----------------------------------------------------------------------------
# Forward: log_softmax(x @ W^T + b, axis=-1)
# ----------------------------------------------------------------------------
def generator_forward(x, params, *, tm=512, out_dtype=None):
    """x: (..., d_model) -> (..., size) log-probabilities.

    Tuning guidance: v6e (128 MiB VMEM) can take tm=1024 / tn=2048;
    v7x (64 MiB) tm=512 / tn=1024 (drop tn for very large d_model);
    v5e prefers tm multiples of 128 and tn 512-1024.
    """
    w_t, b_row = params["w_t"], params["b"]
    size, d_model, tn_eff = params["size"], params["d_model"], params["tn"]
    assert x.shape[-1] == d_model
    n_pad = w_t.shape[1]
    nj = n_pad // tn_eff
    out_dtype = x.dtype if out_dtype is None else out_dtype

    lead = x.shape[:-1]
    M = 1
    for d in lead:
        M *= d

    tm_eff = min(tm, _round_up(M, 8))        # small-M (decode) friendly
    m_pad = _round_up(M, tm_eff)
    nm = m_pad // tm_eff

    # Per-call activation prep only (tiny: M x d_model).
    x2d = x.reshape(M, d_model).astype(jnp.bfloat16)
    if m_pad != M:
        x2d = jnp.pad(x2d, ((0, m_pad - M), (0, 0)))

    x_spec = pl.BlockSpec((tm_eff, d_model), lambda i, j: (i, 0))
    w_spec = pl.BlockSpec((d_model, tn_eff), lambda i, j: (0, j))
    b_spec = pl.BlockSpec((1, tn_eff), lambda i, j: (0, j))
    lse_spec = pl.BlockSpec((tm_eff, 1), lambda i, j: (i, 0))

    # Pass 1: per-row logsumexp (no logits ever hit HBM).
    lse = pl.pallas_call(
        _lse_kernel,
        out_shape=jax.ShapeDtypeStruct((m_pad, 1), jnp.float32),
        grid_spec=pltpu.PrefetchScalarGridSpec(
            num_scalar_prefetch=0,
            grid=(nm, nj),
            in_specs=[x_spec, w_spec, b_spec],
            out_specs=lse_spec,
            scratch_shapes=[pltpu.VMEM((tm_eff, 1), jnp.float32),
                            pltpu.VMEM((tm_eff, 1), jnp.float32)],
        ),
        compiler_params=pltpu.CompilerParams(
            dimension_semantics=("parallel", "arbitrary"),
            vmem_limit_bytes=_VMEM_LIMIT,
        ),
    )(x2d, w_t, b_row)

    # Pass 2: recompute logits tile-by-tile and write normalized output.
    out = pl.pallas_call(
        _out_kernel,
        out_shape=jax.ShapeDtypeStruct((m_pad, n_pad), out_dtype),
        grid_spec=pltpu.PrefetchScalarGridSpec(
            num_scalar_prefetch=0,
            grid=(nm, nj),
            in_specs=[x_spec, w_spec, b_spec, lse_spec],
            out_specs=pl.BlockSpec((tm_eff, tn_eff), lambda i, j: (i, j)),
        ),
        compiler_params=pltpu.CompilerParams(
            dimension_semantics=("parallel", "parallel"),
            vmem_limit_bytes=_VMEM_LIMIT,
        ),
    )(x2d, w_t, b_row, lse)

    return out[:M, :size].reshape(*lead, size)


if __name__ == "__main__":
    # Small shapes consistent with the module: batch=2, seq=8, d_model=32, size=64
    B, S, D_MODEL, SIZE = 2, 8, 32, 64

    key = jax.random.PRNGKey(0)
    kx, kw, kb = jax.random.split(key, 3)

    # nn.Linear(d_model, size) parameters in PyTorch layout: weight (size, d_model).
    bound = 1.0 / (D_MODEL ** 0.5)
    weight = jax.random.uniform(kw, (SIZE, D_MODEL), jnp.float32, -bound, bound)
    bias = jax.random.uniform(kb, (SIZE,), jnp.float32, -bound, bound)

    # One-time parameter prep (transpose / bf16 cast / vocab pad) -- not per call.
    params = prepare_generator_params(weight, bias)

    x = jax.random.normal(kx, (B, S, D_MODEL), jnp.float32)

    out = generator_forward(x, params)
    out = jax.block_until_ready(out)

    # Reference in plain JAX with the same bf16 matmul operands / f32 accumulation.
    xb = x.reshape(B * S, D_MODEL).astype(jnp.bfloat16)
    wb = params["w_t"][:, :SIZE]
    ref_logits = jnp.dot(xb, wb, preferred_element_type=jnp.float32) + bias
    ref = jax.nn.log_softmax(ref_logits, axis=-1).reshape(B, S, SIZE)

    assert out.shape == (B, S, SIZE)
    assert jnp.allclose(out, ref, atol=1e-4, rtol=1e-4), "mismatch vs reference"

    print("KERNEL_OK")
</pallas_src>

<mosaic_0001>
module attributes {stable_mosaic.version = 11 : i64} {
  func.func @_lse_kernel(%arg0: i32, %arg1: i32, %arg2: memref<16x32xbf16, #tpu.memory_space<vmem>>, %arg3: memref<32x128xbf16, #tpu.memory_space<vmem>>, %arg4: memref<1x128xf32, #tpu.memory_space<vmem>>, %arg5: memref<16x1xf32, #tpu.memory_space<vmem>>, %arg6: memref<16x1xf32, #tpu.memory_space<vmem>>, %arg7: memref<16x1xf32, #tpu.memory_space<vmem>>) attributes {dimension_semantics = [#tpu.dimension_semantics<parallel>, #tpu.dimension_semantics<arbitrary>], iteration_bounds = array<i64: 1, 1>, scalar_prefetch = 0 : i64, scratch_operands = 2 : i64, tpu.core_type = #tpu.core_type<tc>, window_params = [{transform_indices = @transform_0, window_bounds = array<i64: 16, 32>}, {transform_indices = @transform_1, window_bounds = array<i64: 32, 128>}, {transform_indices = @transform_2, window_bounds = array<i64: 1, 128>}, {transform_indices = @transform_3, window_bounds = array<i64: 16, 1>}]} {
    %c0_i32 = arith.constant 0 : i32
    %0 = arith.cmpi eq, %arg1, %c0_i32 : i32
    %1 = arith.extui %0 : i1 to i32
    %c0_i32_0 = arith.constant 0 : i32
    %2 = arith.cmpi ne, %1, %c0_i32_0 : i32
    scf.if %2 {
      %cst_18 = arith.constant 0xFF800000 : f32
      %28 = vector.broadcast %cst_18 : f32 to vector<16x1xf32>
      %c0_19 = arith.constant 0 : index
      %c0_20 = arith.constant 0 : index
      %29 = vector.load %arg6[%c0_19, %c0_20] : memref<16x1xf32, #tpu.memory_space<vmem>>, vector<16x1xf32>
      tpu.vector_store %arg6[%c0_19, %c0_20], %28 {strides = array<i32>} : memref<16x1xf32, #tpu.memory_space<vmem>>, vector<16x1xf32>,
      %cst_21 = arith.constant 0.000000e+00 : f32
      %30 = vector.broadcast %cst_21 : f32 to vector<16x1xf32>
      %c0_22 = arith.constant 0 : index
      %c0_23 = arith.constant 0 : index
      %31 = vector.load %arg7[%c0_22, %c0_23] : memref<16x1xf32, #tpu.memory_space<vmem>>, vector<16x1xf32>
      tpu.vector_store %arg7[%c0_22, %c0_23], %30 {strides = array<i32>} : memref<16x1xf32, #tpu.memory_space<vmem>>, vector<16x1xf32>,
    } else {
    }
    %c0 = arith.constant 0 : index
    %c0_1 = arith.constant 0 : index
    %3 = vector.load %arg2[%c0, %c0_1] : memref<16x32xbf16, #tpu.memory_space<vmem>>, vector<16x32xbf16>
    %c0_2 = arith.constant 0 : index
    %c0_3 = arith.constant 0 : index
    %4 = vector.load %arg3[%c0_2, %c0_3] : memref<32x128xbf16, #tpu.memory_space<vmem>>, vector<32x128xbf16>
    %cst = arith.constant dense<0.000000e+00> : vector<16x128xf32>
    %5 = tpu.matmul %3, %4, %cst {dimension_numbers = #tpu.dot_dimension_numbers<[1], [0], [0], [1], [0, 0, 1, 1], [], []>} : vector<16x32xbf16>, vector<32x128xbf16>, vector<16x128xf32> -> vector<16x128xf32>
    %c0_4 = arith.constant 0 : index
    %c0_5 = arith.constant 0 : index
    %6 = vector.load %arg4[%c0_4, %c0_5] : memref<1x128xf32, #tpu.memory_space<vmem>>, vector<1x128xf32>
    %7 = vector.broadcast %6 : vector<1x128xf32> to vector<16x128xf32>
    %8 = arith.addf %5, %7 : vector<16x128xf32>
    %c0_6 = arith.constant 0 : index
    %c0_7 = arith.constant 0 : index
    %9 = vector.load %arg6[%c0_6, %c0_7] : memref<16x1xf32, #tpu.memory_space<vmem>>, vector<16x1xf32>
    %cst_8 = arith.constant dense<0xFF800000> : vector<16xf32>
    %10 = vector.multi_reduction <maximumf>, %8, %cst_8 [1] : vector<16x128xf32> to vector<16xf32>
    %11 = vector.shape_cast %10 : vector<16xf32> to vector<16x1xf32>
    %12 = arith.maximumf %9, %11 : vector<16x1xf32>
    %c0_9 = arith.constant 0 : index
    %c0_10 = arith.constant 0 : index
    %13 = vector.load %arg7[%c0_9, %c0_10] : memref<16x1xf32, #tpu.memory_space<vmem>>, vector<16x1xf32>
    %14 = arith.subf %9, %12 : vector<16x1xf32>
    %15 = math.exp %14 : vector<16x1xf32>
    %16 = arith.mulf %13, %15 : vector<16x1xf32>
    %17 = vector.broadcast %12 : vector<16x1xf32> to vector<16x128xf32>
    %18 = arith.subf %8, %17 : vector<16x128xf32>
    %19 = math.exp %18 : vector<16x128xf32>
    %cst_11 = arith.constant dense<0.000000e+00> : vector<16xf32>
    %20 = vector.multi_reduction <add>, %19, %cst_11 [1] : vector<16x128xf32> to vector<16xf32>
    %21 = vector.shape_cast %20 : vector<16xf32> to vector<16x1xf32>
    %22 = arith.addf %16, %21 : vector<16x1xf32>
    %c0_12 = arith.constant 0 : index
    %c0_13 = arith.constant 0 : index
    %23 = vector.load %arg7[%c0_12, %c0_13] : memref<16x1xf32, #tpu.memory_space<vmem>>, vector<16x1xf32>
    tpu.vector_store %arg7[%c0_12, %c0_13], %22 {strides = array<i32>} : memref<16x1xf32, #tpu.memory_space<vmem>>, vector<16x1xf32>,
    %c0_14 = arith.constant 0 : index
    %c0_15 = arith.constant 0 : index
    %24 = vector.load %arg6[%c0_14, %c0_15] : memref<16x1xf32, #tpu.memory_space<vmem>>, vector<16x1xf32>
    tpu.vector_store %arg6[%c0_14, %c0_15], %12 {strides = array<i32>} : memref<16x1xf32, #tpu.memory_space<vmem>>, vector<16x1xf32>,
    %c0_i32_16 = arith.constant 0 : i32
    %25 = arith.cmpi eq, %arg1, %c0_i32_16 : i32
    %26 = arith.extui %25 : i1 to i32
    %c0_i32_17 = arith.constant 0 : i32
    %27 = arith.cmpi ne, %26, %c0_i32_17 : i32
    scf.if %27 {
      %c0_18 = arith.constant 0 : index
      %c0_19 = arith.constant 0 : index
      %28 = vector.load %arg6[%c0_18, %c0_19] : memref<16x1xf32, #tpu.memory_space<vmem>>, vector<16x1xf32>
      %c0_20 = arith.constant 0 : index
      %c0_21 = arith.constant 0 : index
      %29 = vector.load %arg7[%c0_20, %c0_21] : memref<16x1xf32, #tpu.memory_space<vmem>>, vector<16x1xf32>
      %30 = math.log %29 : vector<16x1xf32>
      %31 = arith.addf %28, %30 : vector<16x1xf32>
      %c0_22 = arith.constant 0 : index
      %c0_23 = arith.constant 0 : index
      %32 = vector.load %arg5[%c0_22, %c0_23] : memref<16x1xf32, #tpu.memory_space<vmem>>, vector<16x1xf32>
      tpu.vector_store %arg5[%c0_22, %c0_23], %31 {strides = array<i32>} : memref<16x1xf32, #tpu.memory_space<vmem>>, vector<16x1xf32>,
    } else {
    }
    return
  }
  func.func @transform_0(%arg0: i32, %arg1: i32) -> (i32, i32) {
    %c0_i32 = arith.constant 0 : i32
    %c0_i32_0 = arith.constant 0 : i32
    return %arg0, %c0_i32 : i32, i32
  }
  func.func @transform_1(%arg0: i32, %arg1: i32) -> (i32, i32) {
    %c0_i32 = arith.constant 0 : i32
    %c0_i32_0 = arith.constant 0 : i32
    return %c0_i32, %arg1 : i32, i32
  }
  func.func @transform_2(%arg0: i32, %arg1: i32) -> (i32, i32) {
    %c0_i32 = arith.constant 0 : i32
    %c0_i32_0 = arith.constant 0 : i32
    return %c0_i32, %arg1 : i32, i32
  }
  func.func @transform_3(%arg0: i32, %arg1: i32) -> (i32, i32) {
    %c0_i32 = arith.constant 0 : i32
    %c0_i32_0 = arith.constant 0 : i32
    return %arg0, %c0_i32 : i32, i32
  }
}

</mosaic_0001>

<bundles_post_ra>
// kernel: tpu_custom_call.1
= control target key start
LH: loop header
LB: loop body
LE: loop exit
PB: predicated region body
PF: predicated region fallthrough
CT: control target
= control target key end

     0   :  { %8 = vsyncpa [#allocation5], 0  ;;  %s309_s0 = inlined_call_operand.hbm [shape: bf16[16,32], index: 0, kind: input, shape index: {}]   ;;  %s310_s1 = inlined_call_operand.hbm [shape: bf16[32,128], index: 1, kind: input, shape index: {}]   ;;  %s311_s2 = inlined_call_operand.vmem [shape: f32[1,128], index: 2, kind: input, shape index: {}]   ;;  %s312_s3 = inlined_call_operand.vmem [shape: f32[16,1], index: 3, kind: output, shape index: {}]  }
   0x1   :  { %s14_s14 = sshll.u32 %s309_s0, 4  ;;  %s15_s14 = int_to_ptr.hbm [resolvable:$true] %s14_s14 }
   0x2   :  { %9 = vsyncpa [#allocation7], 0  ;;  %s257_s15 = smov [#allocation4]   ;;  %s27_s19 = sshll.u32 %s310_s1, 4  ;;  %s28_s19 = int_to_ptr.hbm [resolvable:$true] %s27_s19 }
   0x3   :  { %s16_s16 = sshll.u32 %s257_s15, 4  ;;  %s258_s20 = smov 64   ;;  %s17_s16 = int_to_ptr.vmem [resolvable:$true] %s16_s16 }
   0x4   :  { %s259_s21 = smov 4   ;;  %s260_s22 = smov [#allocation6]  }
   0x5   :  { %22 = dma.hbm_to_vmem [thread:$0]  %s15_s14, 128, %s17_s16, [#allocation5], %s258_s20, %s258_s20, %s259_s21  }
   0x6   :  { %s29_s23 = sshll.u32 %s260_s22, 4  ;;  %s30_s23 = int_to_ptr.vmem [resolvable:$true] %s29_s23 }
   0x7   :  { %35 = dma.hbm_to_vmem [thread:$0]  %s28_s19, 256, %s30_s23, [#allocation7], %s258_s20, %s258_s20, %s259_s21  }
   0x8   :  { %253 = dma.done.wait [#allocation5], 128  }
   0x9   :  { %254 = vsyncadd [#allocation5], 4294967168 }
   0xa   :  { %255 = dma.done.wait [#allocation7], 256  }
   0xb   :  { %256 = vsyncadd [#allocation7], 4294967040  ;;  %v182_v0 = vld [vmem:[#allocation6 + $0x8] sm:$0xff]  ;;  %v181_v1 = vld [vmem:[#allocation6] sm:$0xff]  ;;  %vm83_vm0 = vcmask 261120   ;;  %vm51_vm1 = vcmask 7168  }
   0xc   :  { %93 = vmatpush.bf16.msra.mxu0 %v182_v0  ;;  %v180_v2 = vld [vmem:[#allocation4] sm:$0xff]  ;;  %v261_v3 = vmov -inf   ;;  %v262_v9 = vmov 0   ;;  %v263_v10 = vmov 0.0  }
   0xd   :  { %52 = vst.msk [vmem:[#allocation2] sm:$0xff] %vm51_vm1, %v261_v3  ;;  %v192_v4 = vld [vmem:[%s311_s2] ss:$0 sm:$0xff]  ;;  %190 = vset.pattern.permute.xlu1 %v262_v9  ;;  %191 = vset.pattern.permute.xlu0 %v262_v9 }
   0xe   :  { %53 = vst.msk [vmem:[#allocation2 + $0x8] sm:$0xff] %vm51_vm1, %v261_v3 }
   0xf   :  { %54 = vst.msk [vmem:[#allocation3] sm:$0xff] %vm51_vm1, %v263_v10 }
  0x10   :  { %94 = vmatpush.bf16.msra.mxu0 %v181_v1  ;;  %55 = vst.msk [vmem:[#allocation3 + $0x8] sm:$0xff] %vm51_vm1, %v263_v10 }
  0x13   :  { %179 = vmatmul.msk.bf16.vlgmr.msra.gmra.mxu0 %vm83_vm0, %v180_v2 }
  0x14   :  { %v101_v11 = vld [vmem:[#allocation2] sm:$0xff] }
  0x15   :  { %v102_v15 = vld [vmem:[#allocation2 + $0x8] sm:$0xff] }
  0x16   :  { %v109_v30 = vld [vmem:[#allocation3] sm:$0xff] }
  0x17   :  { %v110_v35 = vld [vmem:[#allocation3 + $0x8] sm:$0xff] }
  0x90   :  { %v96_v5 = vpop.f32.mrf.mxu0 }
  0x91   :  { %v97_v6 = vadd.f32 %v192_v4, %v96_v5 }
  0x93   :  { %103 = vmax.xlane.f32.xlu0 %v97_v6 }
  0x98   :  { %v98_v7 = vpop.f32.mrf.mxu0 }
  0x99   :  { %v99_v8 = vadd.f32 %v192_v4, %v98_v7 }
  0x9b   :  { %105 = vmax.xlane.f32.xlu0 %v99_v8 }
 0x106   :  { %v104_v12 = vpop.xlane.xlu0 %103 }
 0x107   :  { %v107_v13 = vmax.f32 %v101_v11, %v104_v12 }
 0x109   :  { %v111_v14 = vsub.f32 %v101_v11, %v107_v13  ;;  %144 = vst.msk [vmem:[#allocation2] sm:$0xff] %vm51_vm1, %v107_v13  ;;  %121 = vperm.xlu1 %190, %v107_v13  }
 0x10b   :  { %v113_v27 = vmul.f32 1.442695, %v111_v14 }
 0x10e   :  { %v106_v16 = vpop.xlane.xlu0 %105 }
 0x10f   :  { %v108_v17 = vmax.f32 %v102_v15, %v106_v16 }
 0x110   :  { %v149_v43 = vld [vmem:[#allocation2] sm:$0xff] }
 0x111   :  { %v112_v18 = vsub.f32 %v102_v15, %v108_v17  ;;  %145 = vst.msk [vmem:[#allocation2 + $0x8] sm:$0xff] %vm51_vm1, %v108_v17  ;;  %126 = vperm.xlu1 %190, %v108_v17  }
 0x113   :  { %v115_v28 = vmul.f32 1.442695, %v112_v18 }
 0x118   :  { %v150_v47 = vld [vmem:[#allocation2 + $0x8] sm:$0xff] }
 0x17b   :  { %v122_v19 = vpop.permute.xlu1 %121 }
 0x17c   :  { %v129_v20 = vsub.f32 %v97_v6, %v122_v19 }
 0x17e   :  { %v131_v21 = vmul.f32 1.442695, %v129_v20 }
 0x180   :  { %193 = vpow2.f32 %v131_v21 }
 0x183   :  { %v127_v22 = vpop.permute.xlu1 %126 }
 0x184   :  { %v130_v23 = vsub.f32 %v99_v8, %v127_v22 }
 0x186   :  { %v194_v24 = vpop.eup %193  ;;  %v133_v25 = vmul.f32 1.442695, %v130_v23 }
 0x187   :  { %135 = vadd.xlane.f32.xlu2 %v194_v24 }
 0x188   :  { %195 = vpow2.f32 %v133_v25 }
 0x189   :  { %197 = vpow2.f32 %v113_v27 }
 0x18a   :  { %199 = vpow2.f32 %v115_v28 }
 0x18e   :  { %v196_v26 = vpop.eup %195 }
 0x18f   :  { %137 = vadd.xlane.f32.xlu2 %v196_v26  ;;  %v198_v29 = vpop.eup %197 }
 0x190   :  { %v117_v31 = vmul.f32 %v198_v29, %v109_v30  ;;  %v200_v34 = vpop.eup %199 }
 0x191   :  { %v118_v36 = vmul.f32 %v200_v34, %v110_v35 }
 0x1fa   :  { %v136_v32 = vpop.xlane.xlu2 %135 }
 0x1fb   :  { %v139_v33 = vadd.f32 %v136_v32, %v117_v31 }
 0x1fd   :  { %142 = vst.msk [vmem:[#allocation3] sm:$0xff] %vm51_vm1, %v139_v33 }
 0x202   :  { %v138_v37 = vpop.xlane.xlu2 %137 }
 0x203   :  { %v140_v38 = vadd.f32 %v138_v37, %v118_v36 }
 0x204   :  { %v151_v39 = vld [vmem:[#allocation3] sm:$0xff] }
 0x205   :  { %201 = vlog2.f32 %v151_v39  ;;  %143 = vst.msk [vmem:[#allocation3 + $0x8] sm:$0xff] %vm51_vm1, %v140_v38 }
 0x20b   :  { %v202_v40 = vpop.eup %201 }
 0x20c   :  { %v154_v41 = vmul.f32 0.6931472, %v202_v40  ;;  %v152_v42 = vld [vmem:[#allocation3 + $0x8] sm:$0xff] }
 0x20d   :  { %203 = vlog2.f32 %v152_v42 }
 0x20e   :  { %v157_v44 = vadd.f32 %v154_v41, %v149_v43 }
 0x210   :  { %159 = vst.msk [vmem:[%s312_s3] sm:$0xff] %vm51_vm1, %v157_v44 }
 0x213   :  { %v204_v45 = vpop.eup %203 }
 0x214   :  { %v156_v46 = vmul.f32 0.6931472, %v204_v45 }
 0x216   :  { %v158_v48 = vadd.f32 %v156_v46, %v150_v47 }
 0x218   :  { %160 = vst.msk [vmem:[%s312_s3 + $0x8] sm:$0xff] %vm51_vm1, %v158_v48 }
 0x219   :  { %165 = vsyncpa [#allocation5], 1 }
 0x21a   :  { %166 = vsyncpa [#allocation7], 1 }

</bundles_post_ra>
